<compile_context>
chip_gen: v5e
topology: v5e:2x2
jax: 0.10.0
libtpu: 0.0.40
codegen_flags: <defaults>
</compile_context>

<pallas_src>
import jax
import jax.numpy as jnp
from jax.experimental import pallas as pl
from jax.experimental.pallas import tpu as pltpu

_LANE = 128
_SUBLANE = 8


def _round_up(x, m):
    return (x + m - 1) // m * m


def _pad2(a, rows, cols):
    return jnp.pad(a, ((0, rows - a.shape[0]), (0, cols - a.shape[1])))


# ----------------------------- Pallas kernel --------------------------------

def _fused_chebgcn_kernel(lhat_ref, x_ref,
                          w1a_ref, w1b_ref, b1_ref,
                          w2a_ref, w2b_ref, b2_ref,
                          w3a_ref, w3b_ref, b3_ref,
                          pool_ref, lw1_ref, lb1_ref, lw2_ref, lb2_ref,
                          out_ref):
    """Entire ChebGCN forward; activations never leave on-chip memory."""
    lhat = lhat_ref[...]                                   # (Np, Np) bf16

    def cheb_layer(h_bf16, w0_ref, w1_ref, b_ref, apply_relu):
        # ChebConv K=2, lambda_max=2:  out = T0(h) @ W0 + T1(h) @ W1 + b
        #                                   = h @ W0 + (L_hat @ h) @ W1 + b
        th = jnp.dot(lhat, h_bf16,
                     preferred_element_type=jnp.float32)   # (Np, C) f32 accum
        out = (jnp.dot(h_bf16, w0_ref[...],
                       preferred_element_type=jnp.float32)
               + jnp.dot(th.astype(jnp.bfloat16), w1_ref[...],
                         preferred_element_type=jnp.float32)
               + b_ref[...])                               # bias in f32
        if apply_relu:
            out = jnp.maximum(out, 0.0)                    # ReLU in f32
        return out

    # x_ref is already bf16; cast each hidden activation to bf16 exactly once.
    h = cheb_layer(x_ref[...], w1a_ref, w1b_ref, b1_ref, True).astype(jnp.bfloat16)
    h = cheb_layer(h, w2a_ref, w2b_ref, b2_ref, True).astype(jnp.bfloat16)
    h3 = cheb_layer(h, w3a_ref, w3b_ref, b3_ref, False)    # (Np, Op) f32

    # global_mean_pool as P @ h (rows of P average each graph's nodes).
    # Head matmuls have only G(=8 padded) rows -> keep them in f32 for accuracy.
    pooled = jnp.dot(pool_ref[...], h3, preferred_element_type=jnp.float32)  # (Gp, Op)
    z = jnp.dot(pooled, lw1_ref[...], preferred_element_type=jnp.float32) + lb1_ref[...]
    z = jnp.maximum(z, 0.0)
    # TODO(synk): dropout(p=0.5) is identity in eval mode; training-mode RNG not implemented.
    out = jnp.dot(z, lw2_ref[...], preferred_element_type=jnp.float32) + lb2_ref[...]
    out_ref[...] = out.astype(out_ref.dtype)


# ------------------------------- JAX glue -----------------------------------

def build_lhat(edge_index, edge_attr, num_nodes):
    """Dense scaled Chebyshev Laplacian (PyG 'sym' norm, lambda_max=2, no
    added self-loops):  L_hat = -D^{-1/2} A D^{-1/2}  (zero diagonal).
    Duplicate edges accumulate via .add, matching scatter-add semantics."""
    row, col = edge_index[0], edge_index[1]
    a = jnp.zeros((num_nodes, num_nodes), jnp.float32).at[row, col].add(edge_attr)
    deg = a.sum(axis=1)
    d_inv_sqrt = jnp.where(deg > 0, 1.0 / jnp.sqrt(deg), 0.0)
    return -(d_inv_sqrt[:, None] * a * d_inv_sqrt[None, :])


def build_pool_matrix(batch, num_graphs, num_nodes):
    onehot = (batch[None, :] == jnp.arange(num_graphs)[:, None]).astype(jnp.float32)
    counts = jnp.maximum(onehot.sum(axis=1, keepdims=True), 1.0)
    return onehot / counts   # (G, N), rows average each graph's nodes


def cheb_gcn_forward(params, x, edge_index, edge_attr, batch, num_graphs):
    n, c_in = x.shape
    hid = params["c1_w0"].shape[1]
    c_out = params["c3_w0"].shape[1]
    n_mid = params["l1_w"].shape[1]
    n_cls = params["l2_w"].shape[1]

    np_ = _round_up(n, _LANE)            # lane-dense last dims for L_hat / pool
    c0p = _round_up(c_in, _LANE)
    hp = _round_up(hid, _LANE)
    op = _round_up(c_out, _LANE)
    mp = _round_up(n_mid, _LANE)
    clsp = _round_up(n_cls, _LANE)
    gp = _round_up(num_graphs, _SUBLANE)

    # bf16 where the kernel only ever consumes bf16 (L_hat, X, Cheb weights);
    # biases / pool / MLP head stay f32.
    lhat_p = _pad2(build_lhat(edge_index, edge_attr, n), np_, np_).astype(jnp.bfloat16)
    pool_p = _pad2(build_pool_matrix(batch, num_graphs, n), gp, np_)
    x_p = _pad2(x, np_, c0p).astype(jnp.bfloat16)

    w1a = _pad2(params["c1_w0"], c0p, hp).astype(jnp.bfloat16)
    w1b = _pad2(params["c1_w1"], c0p, hp).astype(jnp.bfloat16)
    w2a = _pad2(params["c2_w0"], hp, hp).astype(jnp.bfloat16)
    w2b = _pad2(params["c2_w1"], hp, hp).astype(jnp.bfloat16)
    w3a = _pad2(params["c3_w0"], hp, op).astype(jnp.bfloat16)
    w3b = _pad2(params["c3_w1"], hp, op).astype(jnp.bfloat16)
    b1p = _pad2(params["c1_b"], 1, hp)
    b2p = _pad2(params["c2_b"], 1, hp)
    b3p = _pad2(params["c3_b"], 1, op)
    lw1p = _pad2(params["l1_w"], op, mp)
    lb1p = _pad2(params["l1_b"], 1, mp)
    lw2p = _pad2(params["l2_w"], mp, clsp)
    lb2p = _pad2(params["l2_b"], 1, clsp)

    args = (lhat_p, x_p,
            w1a, w1b, b1p,
            w2a, w2b, b2p,
            w3a, w3b, b3p,
            pool_p, lw1p, lb1p, lw2p, lb2p)

    # --- VMEM budget & cost estimate (sized from the actual padded buffers) ---
    in_bytes = int(sum(a.size * a.dtype.itemsize for a in args))
    out_bytes = int(gp * clsp * 4)
    act_bytes = int(np_ * max(c0p, hp, op) * (4 + 2) * 3)   # f32 + bf16 slabs/layer
    vmem_bytes = int(min(100 * 2**20,
                         max(4 * 2**20, 2 * (in_bytes + out_bytes + act_bytes))))

    flops = 0
    for cin_p, cout_p in ((c0p, hp), (hp, hp), (hp, op)):
        flops += 2 * np_ * np_ * cin_p            # propagation  L_hat @ h
        flops += 2 * 2 * np_ * cin_p * cout_p     # two feature transforms
    flops += 2 * gp * np_ * op                    # pooling
    flops += 2 * gp * op * mp + 2 * gp * mp * clsp
    cost = pl.CostEstimate(flops=int(flops), transcendentals=0,
                           bytes_accessed=int(in_bytes + out_bytes))

    vmem = pl.BlockSpec(memory_space=pltpu.MemorySpace.VMEM)
    out_padded = pl.pallas_call(
        _fused_chebgcn_kernel,
        out_shape=jax.ShapeDtypeStruct((gp, clsp), jnp.float32),
        in_specs=[vmem] * len(args),
        out_specs=vmem,
        compiler_params=pltpu.CompilerParams(vmem_limit_bytes=vmem_bytes),
        cost_estimate=cost,
    )(*args)

    return out_padded[:num_graphs, :n_cls]


def init_params(key, in_channels, hidden_channels, out_channels, num_classes):
    ks = jax.random.split(key, 10)

    def glorot(k, shape):
        fan_in, fan_out = shape[0], shape[1]
        lim = jnp.sqrt(6.0 / (fan_in + fan_out))
        return jax.random.uniform(k, shape, jnp.float32, -lim, lim)

    return {
        # ChebConv weights: one (C_in, C_out) matrix per Chebyshev order k in {0, 1}
        "c1_w0": glorot(ks[0], (in_channels, hidden_channels)),
        "c1_w1": glorot(ks[1], (in_channels, hidden_channels)),
        "c1_b": jnp.zeros((1, hidden_channels), jnp.float32),
        "c2_w0": glorot(ks[2], (hidden_channels, hidden_channels)),
        "c2_w1": glorot(ks[3], (hidden_channels, hidden_channels)),
        "c2_b": jnp.zeros((1, hidden_channels), jnp.float32),
        "c3_w0": glorot(ks[4], (hidden_channels, out_channels)),
        "c3_w1": glorot(ks[5], (hidden_channels, out_channels)),
        "c3_b": jnp.zeros((1, out_channels), jnp.float32),
        # Linear layers stored as (in, out)
        "l1_w": glorot(ks[6], (out_channels, 32)),
        "l1_b": jnp.zeros((1, 32), jnp.float32),
        "l2_w": glorot(ks[7], (32, num_classes)),
        "l2_b": jnp.zeros((1, num_classes), jnp.float32),
    }


# --------------------------------- main --------------------------------------

if __name__ == "__main__":
    in_channels, hidden_channels, out_channels, num_classes = 8, 32, 16, 4
    num_graphs, nodes_per_graph = 2, 8
    num_nodes = num_graphs * nodes_per_graph

    key = jax.random.PRNGKey(0)
    k_x, k_w, k_params = jax.random.split(key, 3)

    # Node features
    x = jax.random.normal(k_x, (num_nodes, in_channels), jnp.float32)

    # Two ring graphs of 8 nodes each; undirected -> both directions present.
    rows, cols = [], []
    for g in range(num_graphs):
        base = g * nodes_per_graph
        for i in range(nodes_per_graph):
            u, v = base + i, base + (i + 1) % nodes_per_graph
            rows += [u, v]
            cols += [v, u]
    edge_index = jnp.array([rows, cols], jnp.int32)           # (2, E)
    num_edges = edge_index.shape[1]
    edge_attr = jax.random.uniform(k_w, (num_edges,), jnp.float32, 0.5, 1.5)
    batch = jnp.repeat(jnp.arange(num_graphs, dtype=jnp.int32), nodes_per_graph)

    params = init_params(k_params, in_channels, hidden_channels, out_channels, num_classes)

    out = cheb_gcn_forward(params, x, edge_index, edge_attr, batch, num_graphs)
    out = jax.block_until_ready(out)
    assert out.shape == (num_graphs, num_classes)
    assert jnp.all(jnp.isfinite(out))
    print("KERNEL_OK")
</pallas_src>

<mosaic_0001>
module attributes {stable_mosaic.version = 11 : i64} {
  func.func @_fused_chebgcn_kernel(%arg0: memref<128x128xbf16, #tpu.memory_space<vmem>>, %arg1: memref<128x128xbf16, #tpu.memory_space<vmem>>, %arg2: memref<128x128xbf16, #tpu.memory_space<vmem>>, %arg3: memref<128x128xbf16, #tpu.memory_space<vmem>>, %arg4: memref<1x128xf32, #tpu.memory_space<vmem>>, %arg5: memref<128x128xbf16, #tpu.memory_space<vmem>>, %arg6: memref<128x128xbf16, #tpu.memory_space<vmem>>, %arg7: memref<1x128xf32, #tpu.memory_space<vmem>>, %arg8: memref<128x128xbf16, #tpu.memory_space<vmem>>, %arg9: memref<128x128xbf16, #tpu.memory_space<vmem>>, %arg10: memref<1x128xf32, #tpu.memory_space<vmem>>, %arg11: memref<8x128xf32, #tpu.memory_space<vmem>>, %arg12: memref<128x128xf32, #tpu.memory_space<vmem>>, %arg13: memref<1x128xf32, #tpu.memory_space<vmem>>, %arg14: memref<128x128xf32, #tpu.memory_space<vmem>>, %arg15: memref<1x128xf32, #tpu.memory_space<vmem>>, %arg16: memref<8x128xf32, #tpu.memory_space<vmem>>) attributes {dimension_semantics = [], scalar_prefetch = 0 : i64, scratch_operands = 0 : i64, tpu.core_type = #tpu.core_type<tc>} {
    %c0 = arith.constant 0 : index
    %c0_0 = arith.constant 0 : index
    %0 = vector.load %arg0[%c0, %c0_0] : memref<128x128xbf16, #tpu.memory_space<vmem>>, vector<128x128xbf16>
    %c0_1 = arith.constant 0 : index
    %c0_2 = arith.constant 0 : index
    %1 = vector.load %arg1[%c0_1, %c0_2] : memref<128x128xbf16, #tpu.memory_space<vmem>>, vector<128x128xbf16>
    %cst = arith.constant dense<0.000000e+00> : vector<128x128xf32>
    %2 = tpu.matmul %0, %1, %cst {dimension_numbers = #tpu.dot_dimension_numbers<[1], [0], [0], [1], [0, 0, 1, 1], [], []>} : vector<128x128xbf16>, vector<128x128xbf16>, vector<128x128xf32> -> vector<128x128xf32>
    %c0_3 = arith.constant 0 : index
    %c0_4 = arith.constant 0 : index
    %3 = vector.load %arg2[%c0_3, %c0_4] : memref<128x128xbf16, #tpu.memory_space<vmem>>, vector<128x128xbf16>
    %cst_5 = arith.constant dense<0.000000e+00> : vector<128x128xf32>
    %4 = tpu.matmul %1, %3, %cst_5 {dimension_numbers = #tpu.dot_dimension_numbers<[1], [0], [0], [1], [0, 0, 1, 1], [], []>} : vector<128x128xbf16>, vector<128x128xbf16>, vector<128x128xf32> -> vector<128x128xf32>
    %5 = arith.truncf %2 : vector<128x128xf32> to vector<128x128xbf16>
    %c0_6 = arith.constant 0 : index
    %c0_7 = arith.constant 0 : index
    %6 = vector.load %arg3[%c0_6, %c0_7] : memref<128x128xbf16, #tpu.memory_space<vmem>>, vector<128x128xbf16>
    %cst_8 = arith.constant dense<0.000000e+00> : vector<128x128xf32>
    %7 = tpu.matmul %5, %6, %cst_8 {dimension_numbers = #tpu.dot_dimension_numbers<[1], [0], [0], [1], [0, 0, 1, 1], [], []>} : vector<128x128xbf16>, vector<128x128xbf16>, vector<128x128xf32> -> vector<128x128xf32>
    %8 = arith.addf %4, %7 : vector<128x128xf32>
    %c0_9 = arith.constant 0 : index
    %c0_10 = arith.constant 0 : index
    %9 = vector.load %arg4[%c0_9, %c0_10] : memref<1x128xf32, #tpu.memory_space<vmem>>, vector<1x128xf32>
    %10 = vector.broadcast %9 : vector<1x128xf32> to vector<128x128xf32>
    %11 = arith.addf %8, %10 : vector<128x128xf32>
    %cst_11 = arith.constant 0.000000e+00 : f32
    %12 = vector.broadcast %cst_11 : f32 to vector<128x128xf32>
    %13 = arith.maximumf %11, %12 : vector<128x128xf32>
    %14 = arith.truncf %13 : vector<128x128xf32> to vector<128x128xbf16>
    %cst_12 = arith.constant dense<0.000000e+00> : vector<128x128xf32>
    %15 = tpu.matmul %0, %14, %cst_12 {dimension_numbers = #tpu.dot_dimension_numbers<[1], [0], [0], [1], [0, 0, 1, 1], [], []>} : vector<128x128xbf16>, vector<128x128xbf16>, vector<128x128xf32> -> vector<128x128xf32>
    %c0_13 = arith.constant 0 : index
    %c0_14 = arith.constant 0 : index
    %16 = vector.load %arg5[%c0_13, %c0_14] : memref<128x128xbf16, #tpu.memory_space<vmem>>, vector<128x128xbf16>
    %cst_15 = arith.constant dense<0.000000e+00> : vector<128x128xf32>
    %17 = tpu.matmul %14, %16, %cst_15 {dimension_numbers = #tpu.dot_dimension_numbers<[1], [0], [0], [1], [0, 0, 1, 1], [], []>} : vector<128x128xbf16>, vector<128x128xbf16>, vector<128x128xf32> -> vector<128x128xf32>
    %18 = arith.truncf %15 : vector<128x128xf32> to vector<128x128xbf16>
    %c0_16 = arith.constant 0 : index
    %c0_17 = arith.constant 0 : index
    %19 = vector.load %arg6[%c0_16, %c0_17] : memref<128x128xbf16, #tpu.memory_space<vmem>>, vector<128x128xbf16>
    %cst_18 = arith.constant dense<0.000000e+00> : vector<128x128xf32>
    %20 = tpu.matmul %18, %19, %cst_18 {dimension_numbers = #tpu.dot_dimension_numbers<[1], [0], [0], [1], [0, 0, 1, 1], [], []>} : vector<128x128xbf16>, vector<128x128xbf16>, vector<128x128xf32> -> vector<128x128xf32>
    %21 = arith.addf %17, %20 : vector<128x128xf32>
    %c0_19 = arith.constant 0 : index
    %c0_20 = arith.constant 0 : index
    %22 = vector.load %arg7[%c0_19, %c0_20] : memref<1x128xf32, #tpu.memory_space<vmem>>, vector<1x128xf32>
    %23 = vector.broadcast %22 : vector<1x128xf32> to vector<128x128xf32>
    %24 = arith.addf %21, %23 : vector<128x128xf32>
    %cst_21 = arith.constant 0.000000e+00 : f32
    %25 = vector.broadcast %cst_21 : f32 to vector<128x128xf32>
    %26 = arith.maximumf %24, %25 : vector<128x128xf32>
    %27 = arith.truncf %26 : vector<128x128xf32> to vector<128x128xbf16>
    %cst_22 = arith.constant dense<0.000000e+00> : vector<128x128xf32>
    %28 = tpu.matmul %0, %27, %cst_22 {dimension_numbers = #tpu.dot_dimension_numbers<[1], [0], [0], [1], [0, 0, 1, 1], [], []>} : vector<128x128xbf16>, vector<128x128xbf16>, vector<128x128xf32> -> vector<128x128xf32>
    %c0_23 = arith.constant 0 : index
    %c0_24 = arith.constant 0 : index
    %29 = vector.load %arg8[%c0_23, %c0_24] : memref<128x128xbf16, #tpu.memory_space<vmem>>, vector<128x128xbf16>
    %cst_25 = arith.constant dense<0.000000e+00> : vector<128x128xf32>
    %30 = tpu.matmul %27, %29, %cst_25 {dimension_numbers = #tpu.dot_dimension_numbers<[1], [0], [0], [1], [0, 0, 1, 1], [], []>} : vector<128x128xbf16>, vector<128x128xbf16>, vector<128x128xf32> -> vector<128x128xf32>
    %31 = arith.truncf %28 : vector<128x128xf32> to vector<128x128xbf16>
    %c0_26 = arith.constant 0 : index
    %c0_27 = arith.constant 0 : index
    %32 = vector.load %arg9[%c0_26, %c0_27] : memref<128x128xbf16, #tpu.memory_space<vmem>>, vector<128x128xbf16>
    %cst_28 = arith.constant dense<0.000000e+00> : vector<128x128xf32>
    %33 = tpu.matmul %31, %32, %cst_28 {dimension_numbers = #tpu.dot_dimension_numbers<[1], [0], [0], [1], [0, 0, 1, 1], [], []>} : vector<128x128xbf16>, vector<128x128xbf16>, vector<128x128xf32> -> vector<128x128xf32>
    %34 = arith.addf %30, %33 : vector<128x128xf32>
    %c0_29 = arith.constant 0 : index
    %c0_30 = arith.constant 0 : index
    %35 = vector.load %arg10[%c0_29, %c0_30] : memref<1x128xf32, #tpu.memory_space<vmem>>, vector<1x128xf32>
    %36 = vector.broadcast %35 : vector<1x128xf32> to vector<128x128xf32>
    %37 = arith.addf %34, %36 : vector<128x128xf32>
    %c0_31 = arith.constant 0 : index
    %c0_32 = arith.constant 0 : index
    %38 = vector.load %arg11[%c0_31, %c0_32] : memref<8x128xf32, #tpu.memory_space<vmem>>, vector<8x128xf32>
    %cst_33 = arith.constant dense<0.000000e+00> : vector<8x128xf32>
    %39 = tpu.matmul %38, %37, %cst_33 {dimension_numbers = #tpu.dot_dimension_numbers<[1], [0], [0], [1], [0, 0, 1, 1], [], []>} : vector<8x128xf32>, vector<128x128xf32>, vector<8x128xf32> -> vector<8x128xf32>
    %c0_34 = arith.constant 0 : index
    %c0_35 = arith.constant 0 : index
    %40 = vector.load %arg12[%c0_34, %c0_35] : memref<128x128xf32, #tpu.memory_space<vmem>>, vector<128x128xf32>
    %cst_36 = arith.constant dense<0.000000e+00> : vector<8x128xf32>
    %41 = tpu.matmul %39, %40, %cst_36 {dimension_numbers = #tpu.dot_dimension_numbers<[1], [0], [0], [1], [0, 0, 1, 1], [], []>} : vector<8x128xf32>, vector<128x128xf32>, vector<8x128xf32> -> vector<8x128xf32>
    %c0_37 = arith.constant 0 : index
    %c0_38 = arith.constant 0 : index
    %42 = vector.load %arg13[%c0_37, %c0_38] : memref<1x128xf32, #tpu.memory_space<vmem>>, vector<1x128xf32>
    %43 = vector.broadcast %42 : vector<1x128xf32> to vector<8x128xf32>
    %44 = arith.addf %41, %43 : vector<8x128xf32>
    %cst_39 = arith.constant 0.000000e+00 : f32
    %45 = vector.broadcast %cst_39 : f32 to vector<8x128xf32>
    %46 = arith.maximumf %44, %45 : vector<8x128xf32>
    %c0_40 = arith.constant 0 : index
    %c0_41 = arith.constant 0 : index
    %47 = vector.load %arg14[%c0_40, %c0_41] : memref<128x128xf32, #tpu.memory_space<vmem>>, vector<128x128xf32>
    %cst_42 = arith.constant dense<0.000000e+00> : vector<8x128xf32>
    %48 = tpu.matmul %46, %47, %cst_42 {dimension_numbers = #tpu.dot_dimension_numbers<[1], [0], [0], [1], [0, 0, 1, 1], [], []>} : vector<8x128xf32>, vector<128x128xf32>, vector<8x128xf32> -> vector<8x128xf32>
    %c0_43 = arith.constant 0 : index
    %c0_44 = arith.constant 0 : index
    %49 = vector.load %arg15[%c0_43, %c0_44] : memref<1x128xf32, #tpu.memory_space<vmem>>, vector<1x128xf32>
    %50 = vector.broadcast %49 : vector<1x128xf32> to vector<8x128xf32>
    %51 = arith.addf %48, %50 : vector<8x128xf32>
    %c0_45 = arith.constant 0 : index
    %c0_46 = arith.constant 0 : index
    %52 = vector.load %arg16[%c0_45, %c0_46] : memref<8x128xf32, #tpu.memory_space<vmem>>, vector<8x128xf32>
    tpu.vector_store %arg16[%c0_45, %c0_46], %51 {strides = array<i32>} : memref<8x128xf32, #tpu.memory_space<vmem>>, vector<8x128xf32>,
    return
  }
}

</mosaic_0001>

<bundles_post_ra>
// kernel: tpu_custom_call.1
= control target key start
LH: loop header
LB: loop body
LE: loop exit
PB: predicated region body
PF: predicated region fallthrough
CT: control target
= control target key end

     0   :  { %s2468_s0 = inlined_call_operand.hbm [shape: bf16[128,128], index: 0, kind: input, shape index: {}]   ;;  %s2469_s1 = inlined_call_operand.hbm [shape: bf16[128,128], index: 1, kind: input, shape index: {}]   ;;  %s2470_s2 = inlined_call_operand.hbm [shape: bf16[128,128], index: 2, kind: input, shape index: {}]   ;;  %s2471_s3 = inlined_call_operand.hbm [shape: bf16[128,128], index: 3, kind: input, shape index: {}]   ;;  %s2472_s4 = inlined_call_operand.vmem [shape: f32[1,128], index: 4, kind: input, shape index: {}]   ;;  %s2473_s5 = inlined_call_operand.hbm [shape: bf16[128,128], index: 5, kind: input, shape index: {}]   ;;  %s2474_s6 = inlined_call_operand.hbm [shape: bf16[128,128], index: 6, kind: input, shape index: {}]   ;;  %s2475_s7 = inlined_call_operand.vmem [shape: f32[1,128], index: 7, kind: input, shape index: {}]   ;;  %s2476_s8 = inlined_call_operand.hbm [shape: bf16[128,128], index: 8, kind: input, shape index: {}]   ;;  %s2477_s9 = inlined_call_operand.hbm [shape: bf16[128,128], index: 9, kind: input, shape index: {}]   ;;  %s2478_s10 = inlined_call_operand.hbm [shape: f32[1,128], index: 10, kind: input, shape index: {}]   ;;  %s2479_s11 = inlined_call_operand.vmem [shape: f32[8,128], index: 11, kind: input, shape index: {}]   ;;  %s2480_s12 = inlined_call_operand.hbm [shape: f32[128,128], index: 12, kind: input, shape index: {}]   ;;  %s2481_s13 = inlined_call_operand.vmem [shape: f32[1,128], index: 13, kind: input, shape index: {}]   ;;  %s2482_s14 = inlined_call_operand.hbm [shape: f32[128,128], index: 14, kind: input, shape index: {}]   ;;  %s2483_s15 = inlined_call_operand.vmem [shape: f32[1,128], index: 15, kind: input, shape index: {}]   ;;  %s2484_s16 = inlined_call_operand.hbm [shape: f32[8,128], index: 16, kind: output, shape index: {}]  }
   0x1   :  { %2485 = sst [smem:[#allocation28_spill]] %s2468_s0 }
   0x2   :  { %21 = vsyncpa [#allocation3], 0 }
   0x3   :  { %22 = vsyncpa [#allocation6], 0 }
   0x4   :  { %23 = vsyncpa [#allocation9], 0 }
   0x5   :  { %24 = vsyncpa [#allocation12], 0 }
   0x6   :  { %25 = vsyncpa [#allocation15], 0 }
   0x7   :  { %26 = vsyncpa [#allocation18], 0 }
   0x8   :  { %27 = vsyncpa [#allocation4], 0  ;;  %s45_s23 = sshll.u32 %s2469_s1, 4  ;;  %s2100_s24 = smov [#allocation5]   ;;  %s46_s23 = int_to_ptr.hbm [resolvable:$true] %s45_s23 }
   0x9   :  { %s47_s25 = sshll.u32 %s2100_s24, 4  ;;  %s71_s28 = sshll.u32 %s2471_s3, 4  ;;  %s48_s25 = int_to_ptr.vmem [resolvable:$true] %s47_s25  ;;  %s72_s28 = int_to_ptr.hbm [resolvable:$true] %s71_s28 }
   0xa   :  { %s2101_s29 = smov 64   ;;  %s2102_s30 = smov 4  }
   0xb   :  { %53 = dma.hbm_to_vmem [thread:$0]  %s46_s23, 1024, %s48_s25, [#allocation6], %s2101_s29, %s2101_s29, %s2102_s30  }
   0xc   :  { %s2103_s0 = smov [#allocation8]   ;;  %s99_s1 = sshll.u32 %s2474_s6, 4  ;;  %s100_s1 = int_to_ptr.hbm [resolvable:$true] %s99_s1 }
   0xd   :  { %s73_s17 = sshll.u32 %s2103_s0, 4  ;;  %s127_s21 = sshll.u32 %s2477_s9, 4  ;;  %s74_s17 = int_to_ptr.vmem [resolvable:$true] %s73_s17  ;;  %s128_s21 = int_to_ptr.hbm [resolvable:$true] %s127_s21 }
   0xe   :  { %79 = dma.hbm_to_vmem [thread:$0]  %s72_s28, 1024, %s74_s17, [#allocation9], %s2101_s29, %s2101_s29, %s2102_s30  }
   0xf   :  { %s2104_s22 = smov [#allocation11]   ;;  %s2105_s23 = smov [#allocation14]  }
  0x10   :  { %s101_s24 = sshll.u32 %s2104_s22, 4  ;;  %s129_s6 = sshll.u32 %s2105_s23, 4  ;;  %s102_s24 = int_to_ptr.vmem [resolvable:$true] %s101_s24  ;;  %s130_s6 = int_to_ptr.vmem [resolvable:$true] %s129_s6 }
  0x11   :  { %107 = dma.hbm_to_vmem [thread:$0]  %s100_s1, 1024, %s102_s24, [#allocation12], %s2101_s29, %s2101_s29, %s2102_s30  }
  0x12   :  { %s153_s27 = sshll.u32 %s2480_s12, 4  ;;  %s2106_s9 = smov [#allocation17]   ;;  %s154_s27 = int_to_ptr.hbm [resolvable:$true] %s153_s27 }
  0x13   :  { %135 = dma.hbm_to_vmem [thread:$0]  %s128_s21, 1024, %s130_s6, [#allocation15], %s2101_s29, %s2101_s29, %s2102_s30  }
  0x14   :  { %s155_s28 = sshll.u32 %s2106_s9, 4  ;;  %s2486_s18 = sld [smem:[#allocation28_spill]]  ;;  %s156_s28 = int_to_ptr.vmem [resolvable:$true] %s155_s28 }
  0x15   :  { %s2107_s1 = smov 128   ;;  %s2108_s3 = smov 8  }
  0x16   :  { %161 = dma.hbm_to_vmem [thread:$0]  %s154_s27, 2048, %s156_s28, [#allocation18], %s2107_s1, %s2107_s1, %s2108_s3  }
  0x17   :  { %s2109_s12 = smov [#allocation2]   ;;  %s58_s21 = sshll.u32 %s2470_s2, 4  ;;  %s59_s21 = int_to_ptr.hbm [resolvable:$true] %s58_s21 }
  0x18   :  { %s34_s20 = sshll.u32 %s2109_s12, 4  ;;  %s86_s25 = sshll.u32 %s2473_s5, 4  ;;  %s35_s20 = int_to_ptr.vmem [resolvable:$true] %s34_s20  ;;  %s87_s25 = int_to_ptr.hbm [resolvable:$true] %s86_s25 }
  0x19   :  { %s2110_s26 = smov [#allocation7]   ;;  %s2111_s27 = smov [#allocation10]  }
  0x1a   :  { %s32_s19 = sshll.u32 %s2486_s18, 4  ;;  %s60_s9 = sshll.u32 %s2110_s26, 4  ;;  %s33_s19 = int_to_ptr.hbm [resolvable:$true] %s32_s19  ;;  %s61_s9 = int_to_ptr.vmem [resolvable:$true] %s60_s9 }
  0x1b   :  { %40 = dma.hbm_to_vmem [thread:$0]  %s33_s19, 1024, %s35_s20, [#allocation3], %s2101_s29, %s2101_s29, %s2102_s30  }
  0x1c   :  { %66 = dma.hbm_to_vmem [thread:$0]  %s59_s21, 1024, %s61_s9, [#allocation6], %s2101_s29, %s2101_s29, %s2102_s30  }
  0x1d   :  { %s88_s2 = sshll.u32 %s2111_s27, 4  ;;  %s114_s17 = sshll.u32 %s2476_s8, 4  ;;  %s89_s2 = int_to_ptr.vmem [resolvable:$true] %s88_s2  ;;  %s115_s17 = int_to_ptr.hbm [resolvable:$true] %s114_s17 }
  0x1e   :  { %94 = dma.hbm_to_vmem [thread:$0]  %s87_s25, 1024, %s89_s2, [#allocation9], %s2101_s29, %s2101_s29, %s2102_s30  }
  0x1f   :  { %s141_s19 = sshll.u32 %s2478_s10, 4  ;;  %s2112_s12 = smov [#allocation13]   ;;  %s142_s19 = int_to_ptr.hbm [resolvable:$true] %s141_s19 }
  0x20   :  { %s116_s20 = sshll.u32 %s2112_s12, 4  ;;  %s2113_s22 = smov [#allocation16]   ;;  %s117_s20 = int_to_ptr.vmem [resolvable:$true] %s116_s20 }
  0x21   :  { %122 = dma.hbm_to_vmem [thread:$0]  %s115_s17, 1024, %s117_s20, [#allocation12], %s2101_s29, %s2101_s29, %s2102_s30  }
  0x22   :  { %s143_s8 = sshll.u32 %s2113_s22, 4  ;;  %s168_s23 = sshll.u32 %s2482_s14, 4  ;;  %s144_s8 = int_to_ptr.vmem [resolvable:$true] %s143_s8  ;;  %s169_s23 = int_to_ptr.hbm [resolvable:$true] %s168_s23 }
  0x23   :  { %146 = dma.hbm_to_vmem [thread:$0]  %s142_s19, 16, %s144_s8, [#allocation15]  }
  0x24   :  { %s2114_s6 = smov [#allocation19]  }
  0x25   :  { %s170_s25 = sshll.u32 %s2114_s6, 4  ;;  %s171_s25 = int_to_ptr.vmem [resolvable:$true] %s170_s25 }
  0x26   :  { %176 = dma.hbm_to_vmem [thread:$0]  %s169_s23, 2048, %s171_s25, [#allocation18], %s2107_s1, %s2107_s1, %s2108_s3  }
  0x27   :  { %2086 = dma.done.wait [#allocation3], 1024  }
  0x28   :  { %2087 = vsyncadd [#allocation3], 4294966272 }
  0x29   :  { %2088 = dma.done.wait [#allocation6], 2048  }
  0x2a   :  { %2089 = vsyncadd [#allocation6], 4294965248 }
  0x2b   :  { %2090 = dma.done.wait [#allocation9], 2048  }
  0x2c   :  { %2091 = vsyncadd [#allocation9], 4294965248 }
  0x2d   :  { %2092 = dma.done.wait [#allocation12], 2048  }
  0x2e   :  { %2093 = vsyncadd [#allocation12], 4294965248 }
  0x2f   :  { %2094 = dma.done.wait [#allocation15], 1040  }
  0x30   :  { %2095 = vsyncadd [#allocation15], 4294966256 }
  0x31   :  { %2096 = dma.done.wait [#allocation18], 4096  }
  0x32   :  { %2097 = vsyncadd [#allocation18], 4294963200  ;;  %v2264_v0 = vld [vmem:[#allocation5 + $0x38] sm:$0xff]  ;;  %v2267_v1 = vld [vmem:[#allocation5 + $0x30] sm:$0xff]  ;;  %s2115_s9 = smov [#allocation20]   ;;  %s1418_s0 = sshll.u32 %s2484_s16, 4  ;;  %s1419_s0 = int_to_ptr.hbm [resolvable:$true] %s1418_s0 }
  0x33   :  { %351 = vmatpush.bf16.msra.mxu0 %v2264_v0  ;;  %1753 = vmatpush.bf16.msra.mxu1 %v2264_v0  ;;  %v2273_v2 = vld [vmem:[#allocation5 + $0x28] sm:$0xff]  ;;  %v2279_v3 = vld [vmem:[#allocation5 + $0x20] sm:$0xff]  ;;  %v2285_v4 = vld [vmem:[#allocation5 + $0x18] sm:$0xff]  ;;  %s1416_s27 = sshll.u32 %s2115_s9, 4  ;;  %s1417_s27 = int_to_ptr.vmem [resolvable:$true] %s1416_s27 }
  0x34   :  { %1754 = vmatpush.bf16.msra.mxu2 %v2264_v0  ;;  %1755 = vmatpush.bf16.msra.mxu3 %v2264_v0  ;;  %v1699_v5 = vld [vmem:[#allocation5 + $0x10] sm:$0xff]  ;;  %v1698_v6 = vld [vmem:[#allocation5 + $0x8] sm:$0xff]  ;;  %v1697_v7 = vld [vmem:[#allocation5] sm:$0xff] }
  0x35   :  { %v2294_v8 = vld [vmem:[#allocation2] sm:$0xff]  ;;  %v2297_v9 = vld [vmem:[#allocation2 + $0x18] sm:$0xff]  ;;  %v2299_v10 = vld [vmem:[#allocation2 + $0x28] sm:$0xff] }
  0x36   :  { %v1712_v11 = vld [vmem:[#allocation7 + $0x38] sm:$0xff]  ;;  %v1711_v13 = vld [vmem:[#allocation7 + $0x30] sm:$0xff]  ;;  %v1710_v16 = vld [vmem:[#allocation7 + $0x28] sm:$0xff] }
  0x37   :  { %352 = vmatpush.bf16.msra.mxu0 %v2267_v1  ;;  %1756 = vmatpush.bf16.msra.mxu1 %v2267_v1  ;;  %v2303_v12 = vld [vmem:[#allocation2 + $0x38] sm:$0xff]  ;;  %v1719_v15 = vld [vmem:[#allocation8 + $0x30] sm:$0xff]  ;;  %v1718_v17 = vld [vmem:[#allocation8 + $0x28] sm:$0xff] }
  0x38   :  { %1757 = vmatpush.bf16.msra.mxu2 %v2267_v1  ;;  %1758 = vmatpush.bf16.msra.mxu3 %v2267_v1  ;;  %v1720_v14 = vld [vmem:[#allocation8 + $0x38] sm:$0xff]  ;;  %v1709_v18 = vld [vmem:[#allocation7 + $0x20] sm:$0xff]  ;;  %v2306_v19 = vld [vmem:[#allocation2 + $0x8] sm:$0xff] }
  0x39   :  { %v1717_v20 = vld [vmem:[#allocation8 + $0x20] sm:$0xff]  ;;  %v2310_v22 = vld [vmem:[#allocation2 + $0x30] sm:$0xff]  ;;  %v1708_v23 = vld [vmem:[#allocation7 + $0x18] sm:$0xff] }
  0x3a   :  { %v2308_v21 = vld [vmem:[#allocation2 + $0x20] sm:$0xff]  ;;  %v1716_v24 = vld [vmem:[#allocation8 + $0x18] sm:$0xff]  ;;  %v1707_v25 = vld [vmem:[#allocation7 + $0x10] sm:$0xff] }
  0x3b   :  { %353 = vmatpush.bf16.msra.mxu0 %v2273_v2  ;;  %1759 = vmatpush.bf16.msra.mxu1 %v2273_v2  ;;  %v1706_v26 = vld [vmem:[#allocation7 + $0x8] sm:$0xff]  ;;  %v1705_v27 = vld [vmem:[#allocation7] sm:$0xff]  ;;  %v2315_v28 = vld [vmem:[#allocation2 + $0x10] sm:$0xff] }
  0x3c   :  { %1760 = vmatpush.bf16.msra.mxu2 %v2273_v2  ;;  %1761 = vmatpush.bf16.msra.mxu3 %v2273_v2  ;;  %v1715_v29 = vld [vmem:[#allocation8 + $0x10] sm:$0xff]  ;;  %v1714_v30 = vld [vmem:[#allocation8 + $0x8] sm:$0xff]  ;;  %v1713_v31 = vld [vmem:[#allocation8] sm:$0xff] }
  0x3d   :  { %v1728_v48 = vld [vmem:[#allocation10 + $0x38] sm:$0xff]  ;;  %v1727_v52 = vld [vmem:[#allocation10 + $0x30] sm:$0xff]  ;;  %v1726_v53 = vld [vmem:[#allocation10 + $0x28] sm:$0xff] }
  0x3e   :  { %v1725_v54 = vld [vmem:[#allocation10 + $0x20] sm:$0xff]  ;;  %v1724_v56 = vld [vmem:[#allocation10 + $0x18] sm:$0xff]  ;;  %v1723_v60 = vld [vmem:[#allocation10 + $0x10] sm:$0xff] }
  0x3f   :  { %354 = vmatpush.bf16.msra.mxu0 %v2279_v3  ;;  %1762 = vmatpush.bf16.msra.mxu1 %v2279_v3  ;;  %v1722_v61 = vld [vmem:[#allocation10 + $0x8] sm:$0xff]  ;;  %v1721_v63 = vld [vmem:[#allocation10] sm:$0xff] }
  0x40   :  { %1763 = vmatpush.bf16.msra.mxu2 %v2279_v3  ;;  %1764 = vmatpush.bf16.msra.mxu3 %v2279_v3 }
  0x43   :  { %355 = vmatpush.bf16.msra.mxu0 %v2285_v4  ;;  %1765 = vmatpush.bf16.msra.mxu1 %v2285_v4 }
  0x44   :  { %1766 = vmatpush.bf16.msra.mxu2 %v2285_v4  ;;  %1767 = vmatpush.bf16.msra.mxu3 %v2285_v4 }
  0x47   :  { %356 = vmatpush.bf16.msra.mxu0 %v1699_v5  ;;  %1768 = vmatpush.bf16.msra.mxu1 %v1699_v5 }
  0x48   :  { %1769 = vmatpush.bf16.msra.mxu2 %v1699_v5  ;;  %1770 = vmatpush.bf16.msra.mxu3 %v1699_v5 }
  0x4b   :  { %357 = vmatpush.bf16.msra.mxu0 %v1698_v6  ;;  %1771 = vmatpush.bf16.msra.mxu1 %v1698_v6 }
  0x4c   :  { %1772 = vmatpush.bf16.msra.mxu2 %v1698_v6  ;;  %1773 = vmatpush.bf16.msra.mxu3 %v1698_v6 }
  0x4f   :  { %358 = vmatpush.bf16.msra.mxu0 %v1697_v7  ;;  %1774 = vmatpush.bf16.msra.mxu1 %v1697_v7 }
  0x50   :  { %1775 = vmatpush.bf16.msra.mxu2 %v1697_v7  ;;  %1776 = vmatpush.bf16.msra.mxu3 %v1697_v7 }
  0x52   :  { %359 = vmatmul.bf16.vlgmr.msra.gmra.mxu0 %v2294_v8  ;;  %374 = vmatmul.bf16.vlgmr.msra.gmra.mxu1 %v2297_v9 }
  0x53   :  { %384 = vmatmul.bf16.vlgmr.msra.gmra.mxu2 %v2299_v10  ;;  %394 = vmatmul.bf16.vlgmr.msra.gmra.mxu3 %v2303_v12 }
  0x54   :  { %585 = vmatpush.bf16.msrb.mxu2 %v1712_v11  ;;  %488 = vmatpush.bf16.msrb.mxu1 %v1720_v14 }
  0x58   :  { %586 = vmatpush.bf16.msrb.mxu2 %v1711_v13  ;;  %489 = vmatpush.bf16.msrb.mxu1 %v1719_v15 }
  0x5c   :  { %587 = vmatpush.bf16.msrb.mxu2 %v1710_v16  ;;  %490 = vmatpush.bf16.msrb.mxu1 %v1718_v17 }
  0x60   :  { %588 = vmatpush.bf16.msrb.mxu2 %v1709_v18  ;;  %491 = vmatpush.bf16.msrb.mxu1 %v1717_v20 }
  0x62   :  { %364 = vmatmul.bf16.gmra.mxu0 %v2306_v19  ;;  %379 = vmatmul.bf16.gmra.mxu1 %v2308_v21 }
  0x63   :  { %389 = vmatmul.bf16.gmra.mxu2 %v2310_v22 }
  0x64   :  { %589 = vmatpush.bf16.msrb.mxu2 %v1708_v23  ;;  %492 = vmatpush.bf16.msrb.mxu1 %v1716_v24 }
  0x68   :  { %590 = vmatpush.bf16.msrb.mxu2 %v1707_v25  ;;  %493 = vmatpush.bf16.msrb.mxu1 %v1715_v29 }
  0x6c   :  { %591 = vmatpush.bf16.msrb.mxu2 %v1706_v26  ;;  %494 = vmatpush.bf16.msrb.mxu1 %v1714_v30 }
  0x70   :  { %592 = vmatpush.bf16.msrb.mxu2 %v1705_v27  ;;  %495 = vmatpush.bf16.msrb.mxu1 %v1713_v31 }
  0x72   :  { %369 = vmatmul.bf16.gmra.mxu0 %v2315_v28 }
  0x73   :  { %593 = vmatmul.bf16.vlgmr.msrb.gmra.mxu2 %v1697_v7 }
  0x74   :  { %912 = vmatpush.bf16.msra.mxu1 %v1728_v48 }
  0x78   :  { %913 = vmatpush.bf16.msra.mxu1 %v1727_v52 }
  0x7c   :  { %914 = vmatpush.bf16.msra.mxu1 %v1726_v53 }
  0x80   :  { %915 = vmatpush.bf16.msra.mxu1 %v1725_v54 }
  0x83   :  { %598 = vmatmul.bf16.gmra.mxu2 %v1698_v6  ;;  %v2326_v6 = vld [vmem:[%s2472_s4] ss:$0 sm:$0xff] }
  0x84   :  { %916 = vmatpush.bf16.msra.mxu1 %v1724_v56 }
  0x88   :  { %917 = vmatpush.bf16.msra.mxu1 %v1723_v60 }
  0x8c   :  { %918 = vmatpush.bf16.msra.mxu1 %v1722_v61 }
  0x90   :  { %919 = vmatpush.bf16.msra.mxu1 %v1721_v63 }
  0x93   :  { %603 = vmatmul.bf16.gmra.mxu2 %v1699_v5 }
  0xa3   :  { %608 = vmatmul.bf16.gmra.mxu2 %v2285_v4 }
  0xb3   :  { %613 = vmatmul.bf16.gmra.mxu2 %v2279_v3 }
  0xc3   :  { %618 = vmatmul.bf16.gmra.mxu2 %v2273_v2 }
  0xcf   :  { %v360_v32 = vpop.f32.mrf.mxu0  ;;  %v375_v40 = vpop.f32.mrf.mxu1 }
  0xd3   :  { %623 = vmatmul.bf16.gmra.mxu2 %v2267_v1 }
  0xd6   :  { %v385_v45 = vpop.f32.mrf.mxu2  ;;  %v395_v59 = vpop.f32.mrf.mxu3 }
  0xd7   :  { %v362_v33 = vpop.f32.mrf.mxu0  ;;  %v377_v42 = vpop.f32.mrf.mxu1 }
  0xd8   :  { %v416_v34 = vpack.c.bf16 %v362_v33, %v360_v32  ;;  %v419_v43 = vpack.c.bf16 %v377_v42, %v375_v40 }
  0xda   :  { %496 = vmatmul.bf16.vlgmr.msrb.gmra.mxu1 %v416_v34 }
  0xde   :  { %v387_v49 = vpop.f32.mrf.mxu2 }
  0xdf   :  { %v365_v35 = vpop.f32.mrf.mxu0  ;;  %v380_v44 = vpop.f32.mrf.mxu1  ;;  %v421_v51 = vpack.c.bf16 %v387_v49, %v385_v45 }
  0xe3   :  { %628 = vmatmul.bf16.gmra.mxu2 %v2264_v0  ;;  %v397_v0 = vpop.f32.mrf.mxu3 }
  0xe4   :  { %v423_v1 = vpack.c.bf16 %v397_v0, %v395_v59 }
  0xe6   :  { %v390_v50 = vpop.f32.mrf.mxu2 }
  0xe7   :  { %v367_v36 = vpop.f32.mrf.mxu0  ;;  %v382_v46 = vpop.f32.mrf.mxu1 }
  0xe8   :  { %v417_v37 = vpack.c.bf16 %v367_v36, %v365_v35  ;;  %v420_v47 = vpack.c.bf16 %v382_v46, %v380_v44 }
  0xea   :  { %501 = vmatmul.bf16.gmra.mxu1 %v417_v37 }
  0xee   :  { %v392_v55 = vpop.f32.mrf.mxu2 }
  0xef   :  { %v370_v38 = vpop.f32.mrf.mxu0  ;;  %v422_v57 = vpack.c.bf16 %v392_v55, %v390_v50 }
  0xf6   :  { %v594_v58 = vpop.f32.mrf.mxu2 }
  0xf7   :  { %v372_v39 = vpop.f32.mrf.mxu0 }
  0xf8   :  { %v418_v41 = vpack.c.bf16 %v372_v39, %v370_v38 }
  0xfa   :  { %506 = vmatmul.bf16.gmra.mxu1 %v418_v41 }
  0xfe   :  { %v596_v62 = vpop.f32.mrf.mxu2 }
 0x106   :  { %v599_v2 = vpop.f32.mrf.mxu2 }
 0x10a   :  { %511 = vmatmul.bf16.gmra.mxu1 %v419_v43 }
 0x10e   :  { %v601_v4 = vpop.f32.mrf.mxu2 }
 0x116   :  { %v604_v14 = vpop.f32.mrf.mxu2 }
 0x11a   :  { %516 = vmatmul.bf16.gmra.mxu1 %v420_v47 }
 0x11e   :  { %v606_v23 = vpop.f32.mrf.mxu2 }
 0x126   :  { %v609_v32 = vpop.f32.mrf.mxu2 }
 0x12a   :  { %521 = vmatmul.bf16.gmra.mxu1 %v421_v51 }
 0x12e   :  { %v611_v37 = vpop.f32.mrf.mxu2 }
 0x136   :  { %v614_v45 = vpop.f32.mrf.mxu2 }
 0x13a   :  { %526 = vmatmul.bf16.gmra.mxu1 %v422_v57 }
 0x13e   :  { %v616_v51 = vpop.f32.mrf.mxu2 }
 0x146   :  { %v619_v57 = vpop.f32.mrf.mxu2 }
 0x14a   :  { %531 = vmatmul.bf16.gmra.mxu1 %v423_v1 }
 0x157   :  { %v497_v3 = vpop.f32.mrf.mxu1 }
 0x158   :  { %v595_v5 = vadd.f32 %v594_v58, %v497_v3 }
 0x15a   :  { %v638_v11 = vadd.f32 %v2326_v6, %v595_v5 }
 0x15c   :  { %v654_v16 = vmax.f32 %v638_v11, 0.0 }
 0x15f   :  { %v499_v7 = vpop.f32.mrf.mxu1 }
 0x160   :  { %v597_v13 = vadd.f32 %v596_v62, %v499_v7 }
 0x162   :  { %v639_v15 = vadd.f32 %v2326_v6, %v597_v13 }
 0x164   :  { %v655_v17 = vmax.f32 %v639_v15, 0.0 }
 0x166   :  { %v2330_v18 = vpack.c.bf16 %v655_v17, %v654_v16 }
 0x167   :  { %v502_v20 = vpop.f32.mrf.mxu1 }
 0x168   :  { %920 = vmatmul.bf16.vlgmr.msra.gmra.mxu1 %v2330_v18  ;;  %v600_v24 = vadd.f32 %v599_v2, %v502_v20  ;;  %v621_v2 = vpop.f32.mrf.mxu2 }
 0x16a   :  { %v640_v26 = vadd.f32 %v2326_v6, %v600_v24 }
 0x16c   :  { %v656_v30 = vmax.f32 %v640_v26, 0.0 }
 0x16f   :  { %v504_v25 = vpop.f32.mrf.mxu1 }
 0x170   :  { %v602_v27 = vadd.f32 %v601_v4, %v504_v25  ;;  %v624_v11 = vpop.f32.mrf.mxu2 }
 0x172   :  { %v641_v29 = vadd.f32 %v2326_v6, %v602_v27 }
 0x174   :  { %v657_v31 = vmax.f32 %v641_v29, 0.0 }
 0x176   :  { %v2335_v33 = vpack.c.bf16 %v657_v31, %v656_v30 }
 0x177   :  { %v507_v34 = vpop.f32.mrf.mxu1 }
 0x178   :  { %925 = vmatmul.bf16.gmra.mxu1 %v2335_v33  ;;  %v605_v35 = vadd.f32 %v604_v14, %v507_v34  ;;  %v626_v20 = vpop.f32.mrf.mxu2 }
 0x17a   :  { %v642_v38 = vadd.f32 %v2326_v6, %v605_v35 }
 0x17c   :  { %v658_v41 = vmax.f32 %v642_v38, 0.0 }
 0x17f   :  { %v509_v36 = vpop.f32.mrf.mxu1 }
 0x180   :  { %v607_v39 = vadd.f32 %v606_v23, %v509_v36  ;;  %v629_v31 = vpop.f32.mrf.mxu2 }
 0x182   :  { %v643_v40 = vadd.f32 %v2326_v6, %v607_v39 }
 0x184   :  { %v659_v42 = vmax.f32 %v643_v40, 0.0 }
 0x186   :  { %v2340_v43 = vpack.c.bf16 %v659_v42, %v658_v41 }
 0x187   :  { %v512_v44 = vpop.f32.mrf.mxu1 }
 0x188   :  { %930 = vmatmul.bf16.gmra.mxu1 %v2340_v43  ;;  %v610_v46 = vadd.f32 %v609_v32, %v512_v44  ;;  %v631_v36 = vpop.f32.mrf.mxu2 }
 0x18a   :  { %v644_v48 = vadd.f32 %v2326_v6, %v610_v46  ;;  %v1731_v46 = vld [vmem:[#allocation11 + $0x10] sm:$0xff] }
 0x18c   :  { %v660_v52 = vmax.f32 %v644_v48, 0.0  ;;  %v1729_v48 = vld [vmem:[#allocation11] sm:$0xff] }
 0x18f   :  { %v514_v47 = vpop.f32.mrf.mxu1 }
 0x190   :  { %v612_v49 = vadd.f32 %v611_v37, %v514_v47  ;;  %v1730_v47 = vld [vmem:[#allocation11 + $0x8] sm:$0xff] }
 0x192   :  { %v645_v50 = vadd.f32 %v2326_v6, %v612_v49 }
 0x194   :  { %v661_v53 = vmax.f32 %v645_v50, 0.0 }
 0x196   :  { %v673_v54 = vpack.c.bf16 %v661_v53, %v660_v52 }
 0x197   :  { %v517_v55 = vpop.f32.mrf.mxu1 }
 0x198   :  { %935 = vmatmul.bf16.gmra.mxu1 %v673_v54  ;;  %v615_v56 = vadd.f32 %v614_v45, %v517_v55  ;;  %v1735_v45 = vld [vmem:[#allocation11 + $0x30] sm:$0xff] }
 0x19a   :  { %v646_v59 = vadd.f32 %v2326_v6, %v615_v56 }
 0x19c   :  { %v662_v62 = vmax.f32 %v646_v59, 0.0 }
 0x19f   :  { %v519_v58 = vpop.f32.mrf.mxu1 }
 0x1a0   :  { %v617_v60 = vadd.f32 %v616_v51, %v519_v58 }
 0x1a2   :  { %v647_v61 = vadd.f32 %v2326_v6, %v617_v60 }
 0x1a4   :  { %v663_v63 = vmax.f32 %v647_v61, 0.0 }
 0x1a6   :  { %v674_v0 = vpack.c.bf16 %v663_v63, %v662_v62 }
 0x1a7   :  { %v522_v1 = vpop.f32.mrf.mxu1 }
 0x1a8   :  { %940 = vmatmul.bf16.gmra.mxu1 %v674_v0  ;;  %v620_v3 = vadd.f32 %v619_v57, %v522_v1 }
 0x1aa   :  { %v648_v5 = vadd.f32 %v2326_v6, %v620_v3 }
 0x1ac   :  { %v664_v14 = vmax.f32 %v648_v5, 0.0  ;;  %v1742_v5 = vld [vmem:[#allocation13 + $0x28] sm:$0xff] }
 0x1af   :  { %v524_v4 = vpop.f32.mrf.mxu1 }
 0x1b0   :  { %v622_v7 = vadd.f32 %v621_v2, %v524_v4  ;;  %v1744_v2 = vld [vmem:[#allocation13 + $0x38] sm:$0xff]  ;;  %v1743_v4 = vld [vmem:[#allocation13 + $0x30] sm:$0xff] }
 0x1b2   :  { %v649_v13 = vadd.f32 %v2326_v6, %v622_v7 }
 0x1b4   :  { %v665_v15 = vmax.f32 %v649_v13, 0.0 }
 0x1b6   :  { %v675_v16 = vpack.c.bf16 %v665_v15, %v664_v14  ;;  %v1740_v14 = vld [vmem:[#allocation13 + $0x18] sm:$0xff] }
 0x1b7   :  { %v527_v17 = vpop.f32.mrf.mxu1 }
 0x1b8   :  { %945 = vmatmul.bf16.gmra.mxu1 %v675_v16  ;;  %v625_v23 = vadd.f32 %v624_v11, %v527_v17  ;;  %v1741_v11 = vld [vmem:[#allocation13 + $0x20] sm:$0xff]  ;;  %v1739_v17 = vld [vmem:[#allocation13 + $0x10] sm:$0xff] }
 0x1ba   :  { %v650_v25 = vadd.f32 %v2326_v6, %v625_v23  ;;  %v1738_v23 = vld [vmem:[#allocation13 + $0x8] sm:$0xff] }
 0x1bc   :  { %v666_v29 = vmax.f32 %v650_v25, 0.0  ;;  %v1737_v25 = vld [vmem:[#allocation13] sm:$0xff] }
 0x1bf   :  { %v529_v24 = vpop.f32.mrf.mxu1 }
 0x1c0   :  { %v627_v26 = vadd.f32 %v626_v20, %v529_v24 }
 0x1c2   :  { %v651_v27 = vadd.f32 %v2326_v6, %v627_v26 }
 0x1c4   :  { %v667_v30 = vmax.f32 %v651_v27, 0.0 }
 0x1c6   :  { %v676_v32 = vpack.c.bf16 %v667_v30, %v666_v29 }
 0x1c7   :  { %v532_v34 = vpop.f32.mrf.mxu1 }
 0x1c8   :  { %950 = vmatmul.bf16.gmra.mxu1 %v676_v32  ;;  %v630_v35 = vadd.f32 %v629_v31, %v532_v34  ;;  %v2367_v34 = vld [vmem:[%s2475_s7] ss:$0 sm:$0xff] }
 0x1ca   :  { %v652_v38 = vadd.f32 %v2326_v6, %v630_v35 }
 0x1cc   :  { %v668_v41 = vmax.f32 %v652_v38, 0.0 }
 0x1cf   :  { %v534_v37 = vpop.f32.mrf.mxu1 }
 0x1d0   :  { %v632_v39 = vadd.f32 %v631_v36, %v534_v37 }
 0x1d2   :  { %v653_v40 = vadd.f32 %v2326_v6, %v632_v39  ;;  %v1736_v6 = vld [vmem:[#allocation11 + $0x38] sm:$0xff] }
 0x1d3   :  { %815 = vmatpush.bf16.msrb.mxu0 %v1736_v6 }
 0x1d4   :  { %v669_v42 = vmax.f32 %v653_v40, 0.0 }
 0x1d6   :  { %v677_v44 = vpack.c.bf16 %v669_v42, %v668_v41 }
 0x1d7   :  { %816 = vmatpush.bf16.msrb.mxu0 %v1735_v45 }
 0x1d8   :  { %678 = vmatpush.bf16.msrb.mxu3 %v677_v44  ;;  %955 = vmatmul.bf16.gmra.mxu1 %v677_v44 }
 0x1dc   :  { %679 = vmatpush.bf16.msrb.mxu3 %v676_v32 }
 0x1e0   :  { %680 = vmatpush.bf16.msrb.mxu3 %v675_v16 }
 0x1e4   :  { %681 = vmatpush.bf16.msrb.mxu3 %v674_v0 }
 0x1e5   :  { %v921_v16 = vpop.f32.mrf.mxu1 }
 0x1e8   :  { %682 = vmatpush.bf16.msrb.mxu3 %v673_v54 }
 0x1ec   :  { %683 = vmatpush.bf16.msrb.mxu3 %v2340_v43  ;;  %v1734_v43 = vld [vmem:[#allocation11 + $0x28] sm:$0xff] }
 0x1ed   :  { %817 = vmatpush.bf16.msrb.mxu0 %v1734_v43  ;;  %v923_v24 = vpop.f32.mrf.mxu1 }
 0x1f0   :  { %684 = vmatpush.bf16.msrb.mxu3 %v2335_v33  ;;  %v1733_v33 = vld [vmem:[#allocation11 + $0x20] sm:$0xff] }
 0x1f1   :  { %818 = vmatpush.bf16.msrb.mxu0 %v1733_v33 }
 0x1f4   :  { %685 = vmatpush.bf16.msrb.mxu3 %v2330_v18  ;;  %v1732_v18 = vld [vmem:[#allocation11 + $0x18] sm:$0xff] }
 0x1f5   :  { %819 = vmatpush.bf16.msrb.mxu0 %v1732_v18  ;;  %v926_v29 = vpop.f32.mrf.mxu1 }
 0x1f7   :  { %686 = vmatmul.bf16.vlgmr.msrb.gmra.mxu3 %v2294_v8 }
 0x1f9   :  { %820 = vmatpush.bf16.msrb.mxu0 %v1731_v46 }
 0x1fd   :  { %821 = vmatpush.bf16.msrb.mxu0 %v1730_v47  ;;  %v928_v30 = vpop.f32.mrf.mxu1 }
 0x201   :  { %822 = vmatpush.bf16.msrb.mxu0 %v1729_v48 }
 0x205   :  { %1239 = vmatpush.bf16.msra.mxu0 %v1744_v2  ;;  %v931_v38 = vpop.f32.mrf.mxu1 }
 0x207   :  { %691 = vmatmul.bf16.gmra.mxu3 %v2306_v19 }
 0x209   :  { %1240 = vmatpush.bf16.msra.mxu0 %v1743_v4 }
 0x20d   :  { %1241 = vmatpush.bf16.msra.mxu0 %v1742_v5  ;;  %v933_v6 = vpop.f32.mrf.mxu1 }
 0x211   :  { %1242 = vmatpush.bf16.msra.mxu0 %v1741_v11 }
 0x215   :  { %1243 = vmatpush.bf16.msra.mxu0 %v1740_v14 }
 0x217   :  { %696 = vmatmul.bf16.gmra.mxu3 %v2315_v28 }
 0x219   :  { %1244 = vmatpush.bf16.msra.mxu0 %v1739_v17 }
 0x21d   :  { %1245 = vmatpush.bf16.msra.mxu0 %v1738_v23 }
 0x221   :  { %1246 = vmatpush.bf16.msra.mxu0 %v1737_v25 }
 0x227   :  { %701 = vmatmul.bf16.gmra.mxu3 %v2297_v9 }
 0x237   :  { %706 = vmatmul.bf16.gmra.mxu3 %v2308_v21 }
 0x247   :  { %711 = vmatmul.bf16.gmra.mxu3 %v2299_v10 }
 0x257   :  { %716 = vmatmul.bf16.gmra.mxu3 %v2310_v22 }
 0x267   :  { %721 = vmatmul.bf16.gmra.mxu3 %v2303_v12 }
 0x27a   :  { %v687_v49 = vpop.f32.mrf.mxu3 }
 0x282   :  { %v689_v50 = vpop.f32.mrf.mxu3 }
 0x283   :  { %v743_v51 = vpack.c.bf16 %v689_v50, %v687_v49  ;;  %v936_v49 = vpop.f32.mrf.mxu1 }
 0x285   :  { %823 = vmatmul.bf16.vlgmr.msrb.gmra.mxu0 %v743_v51 }
 0x28a   :  { %v692_v52 = vpop.f32.mrf.mxu3 }
 0x292   :  { %v694_v53 = vpop.f32.mrf.mxu3 }
 0x293   :  { %v744_v54 = vpack.c.bf16 %v694_v53, %v692_v52  ;;  %v938_v53 = vpop.f32.mrf.mxu1 }
 0x295   :  { %828 = vmatmul.bf16.gmra.mxu0 %v744_v54 }
 0x29a   :  { %v697_v55 = vpop.f32.mrf.mxu3 }
 0x2a2   :  { %v699_v56 = vpop.f32.mrf.mxu3 }
 0x2a3   :  { %v745_v57 = vpack.c.bf16 %v699_v56, %v697_v55 }
 0x2a5   :  { %833 = vmatmul.bf16.gmra.mxu0 %v745_v57 }
 0x2aa   :  { %v702_v58 = vpop.f32.mrf.mxu3 }
 0x2b2   :  { %v704_v59 = vpop.f32.mrf.mxu3 }
 0x2b3   :  { %v746_v60 = vpack.c.bf16 %v704_v59, %v702_v58 }
 0x2b5   :  { %838 = vmatmul.bf16.gmra.mxu0 %v746_v60 }
 0x2ba   :  { %v707_v61 = vpop.f32.mrf.mxu3 }
 0x2c2   :  { %v709_v62 = vpop.f32.mrf.mxu3 }
 0x2c3   :  { %v747_v63 = vpack.c.bf16 %v709_v62, %v707_v61  ;;  %v941_v62 = vpop.f32.mrf.mxu1 }
 0x2c5   :  { %843 = vmatmul.bf16.gmra.mxu0 %v747_v63 }
 0x2ca   :  { %v712_v0 = vpop.f32.mrf.mxu3 }
 0x2cb   :  { %v943_v4 = vpop.f32.mrf.mxu1 }
 0x2d2   :  { %v714_v1 = vpop.f32.mrf.mxu3 }
 0x2d3   :  { %v748_v3 = vpack.c.bf16 %v714_v1, %v712_v0 }
 0x2d5   :  { %848 = vmatmul.bf16.gmra.mxu0 %v748_v3 }
 0x2da   :  { %v717_v7 = vpop.f32.mrf.mxu3 }
 0x2e2   :  { %v719_v13 = vpop.f32.mrf.mxu3 }
 0x2e3   :  { %v749_v15 = vpack.c.bf16 %v719_v13, %v717_v7 }
 0x2e5   :  { %853 = vmatmul.bf16.gmra.mxu0 %v749_v15  ;;  %v946_v15 = vpop.f32.mrf.mxu1 }
 0x2ea   :  { %v722_v20 = vpop.f32.mrf.mxu3 }
 0x2f2   :  { %v724_v26 = vpop.f32.mrf.mxu3 }
 0x2f3   :  { %v750_v27 = vpack.c.bf16 %v724_v26, %v722_v20 }
 0x2f5   :  { %858 = vmatmul.bf16.gmra.mxu0 %v750_v27  ;;  %v948_v27 = vpop.f32.mrf.mxu1 }
 0x302   :  { %v824_v31 = vpop.f32.mrf.mxu0 }
 0x303   :  { %v922_v32 = vadd.f32 %v921_v16, %v824_v31 }
 0x305   :  { %v965_v36 = vadd.f32 %v2367_v34, %v922_v32 }
 0x307   :  { %v981_v40 = vmax.f32 %v965_v36, 0.0  ;;  %v951_v36 = vpop.f32.mrf.mxu1 }
 0x30a   :  { %v826_v35 = vpop.f32.mrf.mxu0 }
 0x30b   :  { %v924_v37 = vadd.f32 %v923_v24, %v826_v35 }
 0x30d   :  { %v966_v39 = vadd.f32 %v2367_v34, %v924_v37 }
 0x30f   :  { %v982_v41 = vmax.f32 %v966_v39, 0.0 }
 0x311   :  { %v2371_v42 = vpack.c.bf16 %v982_v41, %v981_v40 }
 0x312   :  { %v829_v44 = vpop.f32.mrf.mxu0 }
 0x313   :  { %1247 = vmatmul.bf16.vlgmr.msra.gmra.mxu0 %v2371_v42  ;;  %v927_v45 = vadd.f32 %v926_v29, %v829_v44  ;;  %v953_v44 = vpop.f32.mrf.mxu1 }
 0x315   :  { %v967_v33 = vadd.f32 %v2367_v34, %v927_v45 }
 0x317   :  { %v983_v47 = vmax.f32 %v967_v33, 0.0 }
 0x31a   :  { %v831_v43 = vpop.f32.mrf.mxu0 }
 0x31b   :  { %v929_v18 = vadd.f32 %v928_v30, %v831_v43 }
 0x31d   :  { %v968_v46 = vadd.f32 %v2367_v34, %v929_v18 }
 0x31f   :  { %v984_v48 = vmax.f32 %v968_v46, 0.0 }
 0x321   :  { %v2376_v50 = vpack.c.bf16 %v984_v48, %v983_v47  ;;  %v956_v48 = vpop.f32.mrf.mxu1 }
 0x322   :  { %v834_v51 = vpop.f32.mrf.mxu0 }
 0x323   :  { %1252 = vmatmul.bf16.gmra.mxu0 %v2376_v50  ;;  %v932_v52 = vadd.f32 %v931_v38, %v834_v51 }
 0x325   :  { %v969_v55 = vadd.f32 %v2367_v34, %v932_v52 }
 0x327   :  { %v985_v58 = vmax.f32 %v969_v55, 0.0 }
 0x32a   :  { %v836_v54 = vpop.f32.mrf.mxu0 }
 0x32b   :  { %v934_v56 = vadd.f32 %v933_v6, %v836_v54 }
 0x32d   :  { %v970_v57 = vadd.f32 %v2367_v34, %v934_v56 }
 0x32f   :  { %v986_v59 = vmax.f32 %v970_v57, 0.0 }
 0x331   :  { %v2381_v60 = vpack.c.bf16 %v986_v59, %v985_v58 }
 0x332   :  { %v839_v61 = vpop.f32.mrf.mxu0 }
 0x333   :  { %1257 = vmatmul.bf16.gmra.mxu0 %v2381_v60  ;;  %v937_v63 = vadd.f32 %v936_v49, %v839_v61 }
 0x335   :  { %v971_v1 = vadd.f32 %v2367_v34, %v937_v63 }
 0x337   :  { %v987_v5 = vmax.f32 %v971_v1, 0.0 }
 0x33a   :  { %v841_v0 = vpop.f32.mrf.mxu0 }
 0x33b   :  { %v939_v2 = vadd.f32 %v938_v53, %v841_v0  ;;  %v958_v53 = vpop.f32.mrf.mxu1 }
 0x33d   :  { %v972_v3 = vadd.f32 %v2367_v34, %v939_v2 }
 0x33f   :  { %v988_v7 = vmax.f32 %v972_v3, 0.0 }
 0x341   :  { %v1000_v11 = vpack.c.bf16 %v988_v7, %v987_v5 }
 0x342   :  { %v844_v13 = vpop.f32.mrf.mxu0 }
 0x343   :  { %1262 = vmatmul.bf16.gmra.mxu0 %v1000_v11  ;;  %v942_v14 = vadd.f32 %v941_v62, %v844_v13  ;;  %v1751_v62 = vld [vmem:[#allocation14 + $0x30] sm:$0xff] }
 0x345   :  { %v973_v17 = vadd.f32 %v2367_v34, %v942_v14 }
 0x347   :  { %v989_v24 = vmax.f32 %v973_v17, 0.0 }
 0x34a   :  { %v846_v16 = vpop.f32.mrf.mxu0 }
 0x34b   :  { %v944_v20 = vadd.f32 %v943_v4, %v846_v16 }
 0x34d   :  { %v974_v23 = vadd.f32 %v2367_v34, %v944_v20 }
 0x34f   :  { %v990_v25 = vmax.f32 %v974_v23, 0.0 }
 0x351   :  { %v1001_v26 = vpack.c.bf16 %v990_v25, %v989_v24 }
 0x352   :  { %v849_v29 = vpop.f32.mrf.mxu0 }
 0x353   :  { %1267 = vmatmul.bf16.gmra.mxu0 %v1001_v26  ;;  %v947_v30 = vadd.f32 %v946_v15, %v849_v29 }
 0x355   :  { %v975_v32 = vadd.f32 %v2367_v34, %v947_v30 }
 0x357   :  { %v991_v38 = vmax.f32 %v975_v32, 0.0 }
 0x35a   :  { %v851_v31 = vpop.f32.mrf.mxu0 }
 0x35b   :  { %v949_v35 = vadd.f32 %v948_v27, %v851_v31 }
 0x35d   :  { %v976_v37 = vadd.f32 %v2367_v34, %v949_v35 }
 0x35f   :  { %v992_v39 = vmax.f32 %v976_v37, 0.0 }
 0x361   :  { %v1002_v40 = vpack.c.bf16 %v992_v39, %v991_v38 }
 0x362   :  { %v854_v41 = vpop.f32.mrf.mxu0 }
 0x363   :  { %1272 = vmatmul.bf16.gmra.mxu0 %v1002_v40  ;;  %v952_v6 = vadd.f32 %v951_v36, %v854_v41 }
 0x365   :  { %v977_v43 = vadd.f32 %v2367_v34, %v952_v6 }
 0x367   :  { %v993_v46 = vmax.f32 %v977_v43, 0.0 }
 0x36a   :  { %v856_v45 = vpop.f32.mrf.mxu0 }
 0x36b   :  { %v954_v33 = vadd.f32 %v953_v44, %v856_v45 }
 0x36d   :  { %v978_v18 = vadd.f32 %v2367_v34, %v954_v33 }
 0x36f   :  { %v994_v47 = vmax.f32 %v978_v18, 0.0 }
 0x371   :  { %v1003_v49 = vpack.c.bf16 %v994_v47, %v993_v46 }
 0x372   :  { %v859_v51 = vpop.f32.mrf.mxu0 }
 0x373   :  { %1277 = vmatmul.bf16.gmra.mxu0 %v1003_v49  ;;  %v957_v52 = vadd.f32 %v956_v48, %v859_v51 }
 0x375   :  { %v979_v55 = vadd.f32 %v2367_v34, %v957_v52 }
 0x377   :  { %v995_v58 = vmax.f32 %v979_v55, 0.0 }
 0x37a   :  { %v861_v54 = vpop.f32.mrf.mxu0 }
 0x37b   :  { %v959_v56 = vadd.f32 %v958_v53, %v861_v54 }
 0x37d   :  { %v980_v57 = vadd.f32 %v2367_v34, %v959_v56  ;;  %v1752_v34 = vld [vmem:[#allocation14 + $0x38] sm:$0xff] }
 0x37e   :  { %1142 = vmatpush.bf16.msra.mxu3 %v1752_v34 }
 0x37f   :  { %v996_v59 = vmax.f32 %v980_v57, 0.0 }
 0x381   :  { %v1004_v61 = vpack.c.bf16 %v996_v59, %v995_v58 }
 0x382   :  { %1143 = vmatpush.bf16.msra.mxu3 %v1751_v62  ;;  %v2427_v62 = vld [vmem:[#allocation16] ss:$0 sm:$0xff] }
 0x383   :  { %1005 = vmatpush.bf16.msra.mxu2 %v1004_v61  ;;  %1282 = vmatmul.bf16.gmra.mxu0 %v1004_v61 }
 0x387   :  { %1006 = vmatpush.bf16.msra.mxu2 %v1003_v49 }
 0x38b   :  { %1007 = vmatpush.bf16.msra.mxu2 %v1002_v40 }
 0x38f   :  { %1008 = vmatpush.bf16.msra.mxu2 %v1001_v26 }
 0x390   :  { %v2405_v24 = vpop.f32.mrf.mxu0 }
 0x393   :  { %1009 = vmatpush.bf16.msra.mxu2 %v1000_v11 }
 0x397   :  { %1010 = vmatpush.bf16.msra.mxu2 %v2381_v60  ;;  %v1750_v60 = vld [vmem:[#allocation14 + $0x28] sm:$0xff] }
 0x398   :  { %1144 = vmatpush.bf16.msra.mxu3 %v1750_v60  ;;  %v2407_v29 = vpop.f32.mrf.mxu0 }
 0x39b   :  { %1011 = vmatpush.bf16.msra.mxu2 %v2376_v50  ;;  %v1749_v50 = vld [vmem:[#allocation14 + $0x20] sm:$0xff] }
 0x39c   :  { %1145 = vmatpush.bf16.msra.mxu3 %v1749_v50 }
 0x39f   :  { %1012 = vmatpush.bf16.msra.mxu2 %v2371_v42  ;;  %v1748_v42 = vld [vmem:[#allocation14 + $0x18] sm:$0xff] }
 0x3a0   :  { %1146 = vmatpush.bf16.msra.mxu3 %v1748_v42  ;;  %v2409_v30 = vpop.f32.mrf.mxu0 }
 0x3a2   :  { %1013 = vmatmul.bf16.vlgmr.msra.gmra.mxu2 %v2294_v8  ;;  %v1747_v8 = vld [vmem:[#allocation14 + $0x10] sm:$0xff] }
 0x3a4   :  { %1147 = vmatpush.bf16.msra.mxu3 %v1747_v8 }
 0x3a8   :  { %v2411_v31 = vpop.f32.mrf.mxu0 }
 0x3b0   :  { %v2417_v36 = vpop.f32.mrf.mxu0 }
 0x3b2   :  { %1018 = vmatmul.bf16.gmra.mxu2 %v2306_v19  ;;  %v1746_v19 = vld [vmem:[#allocation14 + $0x8] sm:$0xff] }
 0x3b3   :  { %1148 = vmatpush.bf16.msra.mxu3 %v1746_v19  ;;  %v1344_v19 = vld [vmem:[#allocation17 + $0x78] sm:$0xff] }
 0x3b4   :  { %1349 = vmatpush.msrb.mxu2 %v1344_v19 }
 0x3b8   :  { %v2421_v38 = vpop.f32.mrf.mxu0 }
 0x3c0   :  { %v1263_v40 = vpop.f32.mrf.mxu0 }
 0x3c2   :  { %1023 = vmatmul.bf16.gmra.mxu2 %v2315_v28 }
 0x3c8   :  { %v1265_v44 = vpop.f32.mrf.mxu0 }
 0x3d0   :  { %v1268_v43 = vpop.f32.mrf.mxu0 }
 0x3d2   :  { %1028 = vmatmul.bf16.gmra.mxu2 %v2297_v9  ;;  %v1745_v9 = vld [vmem:[#allocation14] sm:$0xff] }
 0x3d3   :  { %1149 = vmatpush.bf16.msra.mxu3 %v1745_v9  ;;  %v1343_v9 = vld [vmem:[#allocation17 + $0x70] sm:$0xff] }
 0x3d4   :  { %1350 = vmatpush.msrb.mxu2 %v1343_v9  ;;  %v1797_v9 = vld [vmem:[%s2483_s15] ss:$0 sm:$0xff] }
 0x3d8   :  { %v1270_v18 = vpop.f32.mrf.mxu0 }
 0x3e0   :  { %v1273_v48 = vpop.f32.mrf.mxu0 }
 0x3e2   :  { %1033 = vmatmul.bf16.gmra.mxu2 %v2308_v21 }
 0x3e8   :  { %v1275_v51 = vpop.f32.mrf.mxu0 }
 0x3f0   :  { %v1278_v54 = vpop.f32.mrf.mxu0 }
 0x3f2   :  { %1038 = vmatmul.bf16.gmra.mxu2 %v2299_v10 }
 0x3f8   :  { %v1280_v56 = vpop.f32.mrf.mxu0 }
 0x400   :  { %v1283_v58 = vpop.f32.mrf.mxu0 }
 0x402   :  { %1043 = vmatmul.bf16.gmra.mxu2 %v2310_v22 }
 0x408   :  { %v1285_v61 = vpop.f32.mrf.mxu0 }
 0x412   :  { %1048 = vmatmul.bf16.gmra.mxu2 %v2303_v12 }
 0x425   :  { %v1014_v21 = vpop.f32.mrf.mxu2 }
 0x42d   :  { %v1016_v10 = vpop.f32.mrf.mxu2 }
 0x42e   :  { %v1070_v28 = vpack.c.bf16 %v1016_v10, %v1014_v21 }
 0x430   :  { %1150 = vmatmul.bf16.vlgmr.msra.gmra.mxu3 %v1070_v28  ;;  %v1342_v28 = vld [vmem:[#allocation17 + $0x68] sm:$0xff] }
 0x431   :  { %1351 = vmatpush.msrb.mxu2 %v1342_v28 }
 0x435   :  { %v1019_v63 = vpop.f32.mrf.mxu2 }
 0x43d   :  { %v1021_v0 = vpop.f32.mrf.mxu2 }
 0x43e   :  { %v1071_v1 = vpack.c.bf16 %v1021_v0, %v1019_v63 }
 0x440   :  { %1155 = vmatmul.bf16.gmra.mxu3 %v1071_v1  ;;  %v1341_v1 = vld [vmem:[#allocation17 + $0x60] sm:$0xff] }
 0x441   :  { %1352 = vmatpush.msrb.mxu2 %v1341_v1 }
 0x445   :  { %v1024_v2 = vpop.f32.mrf.mxu2 }
 0x44d   :  { %v1026_v3 = vpop.f32.mrf.mxu2 }
 0x44e   :  { %v1072_v4 = vpack.c.bf16 %v1026_v3, %v1024_v2 }
 0x450   :  { %1160 = vmatmul.bf16.gmra.mxu3 %v1072_v4  ;;  %v1340_v4 = vld [vmem:[#allocation17 + $0x58] sm:$0xff] }
 0x451   :  { %1353 = vmatpush.msrb.mxu2 %v1340_v4 }
 0x455   :  { %v1029_v22 = vpop.f32.mrf.mxu2 }
 0x45d   :  { %v1031_v5 = vpop.f32.mrf.mxu2 }
 0x45e   :  { %v1073_v7 = vpack.c.bf16 %v1031_v5, %v1029_v22 }
 0x460   :  { %1165 = vmatmul.bf16.gmra.mxu3 %v1073_v7  ;;  %v1339_v7 = vld [vmem:[#allocation17 + $0x50] sm:$0xff] }
 0x461   :  { %1354 = vmatpush.msrb.mxu2 %v1339_v7 }
 0x465   :  { %v1034_v11 = vpop.f32.mrf.mxu2 }
 0x46d   :  { %v1036_v13 = vpop.f32.mrf.mxu2 }
 0x46e   :  { %v1074_v14 = vpack.c.bf16 %v1036_v13, %v1034_v11  ;;  %v1338_v13 = vld [vmem:[#allocation17 + $0x48] sm:$0xff] }
 0x46f   :  { %1355 = vmatpush.msrb.mxu2 %v1338_v13 }
 0x470   :  { %1170 = vmatmul.bf16.gmra.mxu3 %v1074_v14 }
 0x475   :  { %v1039_v12 = vpop.f32.mrf.mxu2 }
 0x47d   :  { %v1041_v15 = vpop.f32.mrf.mxu2 }
 0x47e   :  { %v1075_v16 = vpack.c.bf16 %v1041_v15, %v1039_v12  ;;  %v1337_v15 = vld [vmem:[#allocation17 + $0x40] sm:$0xff] }
 0x47f   :  { %1356 = vmatpush.msrb.mxu2 %v1337_v15 }
 0x480   :  { %1175 = vmatmul.bf16.gmra.mxu3 %v1075_v16 }
 0x485   :  { %v1044_v17 = vpop.f32.mrf.mxu2 }
 0x48d   :  { %v1046_v20 = vpop.f32.mrf.mxu2 }
 0x48e   :  { %v1076_v23 = vpack.c.bf16 %v1046_v20, %v1044_v17  ;;  %v1336_v20 = vld [vmem:[#allocation17 + $0x38] sm:$0xff] }
 0x48f   :  { %1357 = vmatpush.msrb.mxu2 %v1336_v20 }
 0x490   :  { %1180 = vmatmul.bf16.gmra.mxu3 %v1076_v23 }
 0x495   :  { %v1049_v25 = vpop.f32.mrf.mxu2 }
 0x49d   :  { %v1051_v26 = vpop.f32.mrf.mxu2 }
 0x49e   :  { %v1077_v27 = vpack.c.bf16 %v1051_v26, %v1049_v25  ;;  %v1335_v26 = vld [vmem:[#allocation17 + $0x30] sm:$0xff] }
 0x49f   :  { %1358 = vmatpush.msrb.mxu2 %v1335_v26 }
 0x4a0   :  { %1185 = vmatmul.bf16.gmra.mxu3 %v1077_v27 }
 0x4b3   :  { %v2413_v32 = vpop.f32.mrf.mxu3 }
 0x4bb   :  { %v2415_v35 = vpop.f32.mrf.mxu3 }
 0x4c3   :  { %v2419_v37 = vpop.f32.mrf.mxu3 }
 0x4cb   :  { %v2423_v39 = vpop.f32.mrf.mxu3 }
 0x4d3   :  { %v2425_v41 = vpop.f32.mrf.mxu3 }
 0x4d4   :  { %v1259_v27 = vadd.f32 %v2417_v36, %v2425_v41  ;;  %v1332_v36 = vld [vmem:[#allocation17 + $0x18] sm:$0xff]  ;;  %v1251_v41 = vadd.f32 %v2407_v29, %v2415_v35 }
 0x4d5   :  { %v1308_v35 = vld [vmem:[%s2479_s11] sm:$0xff] }
 0x4db   :  { %v1163_v6 = vpop.f32.mrf.mxu3 }
 0x4dc   :  { %v1261_v23 = vadd.f32 %v2421_v38, %v1163_v6  ;;  %v1333_v38 = vld [vmem:[#allocation17 + $0x20] sm:$0xff]  ;;  %v1254_v6 = vadd.f32 %v2409_v30, %v2419_v37  ;;  %v1330_v30 = vld [vmem:[#allocation17 + $0x8] sm:$0xff]  ;;  %v1293_v37 = vadd.f32 %v2427_v62, %v1251_v41 }
 0x4e3   :  { %v1166_v45 = vpop.f32.mrf.mxu3 }
 0x4e4   :  { %v1264_v16 = vadd.f32 %v1263_v40, %v1166_v45  ;;  %v1256_v40 = vadd.f32 %v2411_v31, %v2423_v39  ;;  %v1297_v45 = vadd.f32 %v2427_v62, %v1261_v23  ;;  %v1331_v31 = vld [vmem:[#allocation17 + $0x10] sm:$0xff]  ;;  %v1249_v39 = vadd.f32 %v2405_v24, %v2413_v32  ;;  %v1385_v24 = vld [vmem:[#allocation19 + $0x78] sm:$0xff] }
 0x4e5   :  { %v1384_v32 = vld [vmem:[#allocation19 + $0x70] sm:$0xff]  ;;  %1390 = vmatpush.msrb.mxu3 %v1385_v24 }
 0x4e6   :  { %v1292_v29 = vadd.f32 %v2427_v62, %v1249_v39 }
 0x4e7   :  { %1391 = vmatpush.msrb.mxu3 %v1384_v32 }
 0x4eb   :  { %v1168_v33 = vpop.f32.mrf.mxu3 }
 0x4ec   :  { %v1266_v14 = vadd.f32 %v1265_v44, %v1168_v33  ;;  %v1298_v44 = vadd.f32 %v2427_v62, %v1264_v16  ;;  %v1296_v33 = vadd.f32 %v2427_v62, %v1259_v27 }
 0x4ee   :  { %v1299_v25 = vadd.f32 %v2427_v62, %v1266_v14 }
 0x4f3   :  { %v1171_v46 = vpop.f32.mrf.mxu3 }
 0x4f4   :  { %v1269_v47 = vadd.f32 %v1268_v43, %v1171_v46  ;;  %v1334_v43 = vld [vmem:[#allocation17 + $0x28] sm:$0xff]  ;;  %v1294_v46 = vadd.f32 %v2427_v62, %v1254_v6 }
 0x4f5   :  { %1359 = vmatpush.msrb.mxu2 %v1334_v43 }
 0x4f6   :  { %v1300_v17 = vadd.f32 %v2427_v62, %v1269_v47  ;;  %v1329_v47 = vld [vmem:[#allocation17] sm:$0xff] }
 0x4f7   :  { %1360 = vmatpush.msrb.mxu2 %v1333_v38 }
 0x4f9   :  { %1361 = vmatpush.msrb.mxu2 %v1332_v36 }
 0x4fb   :  { %v1173_v49 = vpop.f32.mrf.mxu3  ;;  %1362 = vmatpush.msrb.mxu2 %v1331_v31 }
 0x4fc   :  { %v1271_v22 = vadd.f32 %v1270_v18, %v1173_v49  ;;  %v1295_v18 = vadd.f32 %v2427_v62, %v1256_v40  ;;  %v1382_v49 = vld [vmem:[#allocation19 + $0x60] sm:$0xff] }
 0x4fd   :  { %1363 = vmatpush.msrb.mxu2 %v1330_v30 }
 0x4fe   :  { %v1301_v12 = vadd.f32 %v2427_v62, %v1271_v22 }
 0x4ff   :  { %1364 = vmatpush.msrb.mxu2 %v1329_v47 }
 0x503   :  { %v1176_v52 = vpop.f32.mrf.mxu3 }
 0x504   :  { %v1274_v2 = vadd.f32 %v1273_v48, %v1176_v52  ;;  %v1383_v48 = vld [vmem:[#allocation19 + $0x68] sm:$0xff]  ;;  %v1380_v52 = vld [vmem:[#allocation19 + $0x50] sm:$0xff] }
 0x505   :  { %1392 = vmatpush.msrb.mxu3 %v1383_v48 }
 0x506   :  { %v1302_v11 = vadd.f32 %v2427_v62, %v1274_v2 }
 0x507   :  { %1393 = vmatpush.msrb.mxu3 %v1382_v49 }
 0x50b   :  { %v1178_v53 = vpop.f32.mrf.mxu3 }
 0x50c   :  { %v1276_v63 = vadd.f32 %v1275_v51, %v1178_v53  ;;  %v1381_v51 = vld [vmem:[#allocation19 + $0x58] sm:$0xff]  ;;  %v1379_v53 = vld [vmem:[#allocation19 + $0x48] sm:$0xff] }
 0x50d   :  { %1394 = vmatpush.msrb.mxu3 %v1381_v51 }
 0x50e   :  { %v1303_v5 = vadd.f32 %v2427_v62, %v1276_v63 }
 0x50f   :  { %1395 = vmatpush.msrb.mxu3 %v1380_v52 }
 0x511   :  { %1396 = vmatpush.msrb.mxu3 %v1379_v53 }
 0x513   :  { %v1181_v55 = vpop.f32.mrf.mxu3 }
 0x514   :  { %v1279_v21 = vadd.f32 %v1278_v54, %v1181_v55  ;;  %v1378_v54 = vld [vmem:[#allocation19 + $0x40] sm:$0xff]  ;;  %v1377_v55 = vld [vmem:[#allocation19 + $0x38] sm:$0xff] }
 0x515   :  { %1397 = vmatpush.msrb.mxu3 %v1378_v54 }
 0x516   :  { %v1304_v3 = vadd.f32 %v2427_v62, %v1279_v21 }
 0x517   :  { %1398 = vmatpush.msrb.mxu3 %v1377_v55 }
 0x51b   :  { %v1183_v57 = vpop.f32.mrf.mxu3 }
 0x51c   :  { %v1281_v42 = vadd.f32 %v1280_v56, %v1183_v57  ;;  %v1376_v56 = vld [vmem:[#allocation19 + $0x30] sm:$0xff]  ;;  %v1375_v57 = vld [vmem:[#allocation19 + $0x28] sm:$0xff] }
 0x51d   :  { %1399 = vmatpush.msrb.mxu3 %v1376_v56 }
 0x51e   :  { %v1305_v0 = vadd.f32 %v2427_v62, %v1281_v42 }
 0x51f   :  { %1400 = vmatpush.msrb.mxu3 %v1375_v57 }
 0x523   :  { %v1186_v59 = vpop.f32.mrf.mxu3 }
 0x524   :  { %v1284_v60 = vadd.f32 %v1283_v58, %v1186_v59  ;;  %v1374_v58 = vld [vmem:[#allocation19 + $0x20] sm:$0xff]  ;;  %v1373_v59 = vld [vmem:[#allocation19 + $0x18] sm:$0xff] }
 0x525   :  { %1401 = vmatpush.msrb.mxu3 %v1374_v58 }
 0x526   :  { %v1306_v10 = vadd.f32 %v2427_v62, %v1284_v60 }
 0x527   :  { %1402 = vmatpush.msrb.mxu3 %v1373_v59 }
 0x52b   :  { %v1188_v34 = vpop.f32.mrf.mxu3 }
 0x52c   :  { %v1286_v50 = vadd.f32 %v1285_v61, %v1188_v34  ;;  %v1372_v61 = vld [vmem:[#allocation19 + $0x10] sm:$0xff]  ;;  %v1371_v34 = vld [vmem:[#allocation19 + $0x8] sm:$0xff] }
 0x52d   :  { %1403 = vmatpush.msrb.mxu3 %v1372_v61 }
 0x52e   :  { %v1307_v8 = vadd.f32 %v2427_v62, %v1286_v50  ;;  %v1370_v62 = vld [vmem:[#allocation19] sm:$0xff]  ;;  %v1796_v50 = vld [vmem:[%s2481_s13] ss:$0 sm:$0xff] }
 0x52f   :  { %1404 = vmatpush.msrb.mxu3 %v1371_v34 }
 0x530   :  { %1309 = vmatpush.msrb.mxu1 %v1307_v8 }
 0x531   :  { %1405 = vmatpush.msrb.mxu3 %v1370_v62 }
 0x532   :  { %1310 = vmatpush.msrb.mxu1 %v1306_v10 }
 0x534   :  { %1311 = vmatpush.msrb.mxu1 %v1305_v0 }
 0x536   :  { %1312 = vmatpush.msrb.mxu1 %v1304_v3 }
 0x538   :  { %1313 = vmatpush.msrb.mxu1 %v1303_v5 }
 0x53a   :  { %1314 = vmatpush.msrb.mxu1 %v1302_v11 }
 0x53c   :  { %1315 = vmatpush.msrb.mxu1 %v1301_v12 }
 0x53e   :  { %1316 = vmatpush.msrb.mxu1 %v1300_v17 }
 0x540   :  { %1317 = vmatpush.msrb.mxu1 %v1299_v25 }
 0x542   :  { %1318 = vmatpush.msrb.mxu1 %v1298_v44 }
 0x544   :  { %1319 = vmatpush.msrb.mxu1 %v1297_v45 }
 0x546   :  { %1320 = vmatpush.msrb.mxu1 %v1296_v33 }
 0x548   :  { %1321 = vmatpush.msrb.mxu1 %v1295_v18 }
 0x54a   :  { %1322 = vmatpush.msrb.mxu1 %v1294_v46 }
 0x54c   :  { %1323 = vmatpush.msrb.mxu1 %v1293_v37 }
 0x54e   :  { %1324 = vmatpush.msrb.mxu1 %v1292_v29 }
 0x54f   :  { %1325 = vmatmul.f32.vlgmr.msrb.gmra.mxu1 %v1308_v35 }
 0x5cc   :  { %v1326_v60 = vpop.f32.mrf.mxu1 }
 0x5cd   :  { %1365 = vmatmul.f32.vlgmr.msrb.gmra.mxu2 %v1326_v60 }
 0x650   :  { %v1366_v42 = vpop.f32.mrf.mxu2 }
 0x651   :  { %v1367_v8 = vadd.f32 %v1796_v50, %v1366_v42 }
 0x653   :  { %v1369_v19 = vmax.f32 %v1367_v8, 0.0 }
 0x655   :  { %1406 = vmatmul.f32.vlgmr.msrb.gmra.mxu3 %v1369_v19 }
 0x6d8   :  { %v1407_v21 = vpop.f32.mrf.mxu3 }
 0x6d9   :  { %v1408_v10 = vadd.f32 %v1797_v9, %v1407_v21 }
 0x6db   :  { %1410 = vst [vmem:[#allocation20] sm:$0xff] %v1408_v10 }
 0x6dc   :  { %1421 = dma.vmem_to_hbm [thread:$0]  %s1417_s27, 128, %s1419_s0, [#allocation4]  }
 0x6dd   :  { %2098 = dma.done.wait [#allocation4], 128  }
 0x6de   :  { %2099 = vsyncadd [#allocation4], 4294967168 }
 0x6df   :  { %1426 = vsyncpa [#allocation3], 1 }
 0x6e0   :  { %1427 = vsyncpa [#allocation6], 1 }
 0x6e1   :  { %1428 = vsyncpa [#allocation9], 1 }
 0x6e2   :  { %1429 = vsyncpa [#allocation12], 1 }
 0x6e3   :  { %1430 = vsyncpa [#allocation15], 1 }
 0x6e4   :  { %1431 = vsyncpa [#allocation18], 1 }
 0x6e5   :  { %1432 = vsyncpa [#allocation4], 1 }

</bundles_post_ra>
